<compile_context>
chip_gen: v6e
topology: v6e:2x2x1
jax: 0.10.0
libtpu: 0.0.40
codegen_flags: <defaults>
</compile_context>

<pallas_src>
import jax
import jax.numpy as jnp
from jax.experimental import pallas as pl
from jax.experimental.pallas import tpu as pltpu


_LANE = 128
# Per-tile byte budget. With default double buffering this means at most
# 4 * 4 MiB = 16 MiB of VMEM buffers, which fits every TPU generation's
# scoped-VMEM budget (v5e 16 MiB default, v6e 32 MiB, v7x 64 MiB physical).
_MAX_TILE_BYTES = 4 * 1024 * 1024
_VMEM_LIMIT_BYTES = 32 * 1024 * 1024


def _identity_kernel(x_ref, o_ref):
    # Elementwise pass-through of the current tile (VMEM load + store; the
    # real cost is the HBM<->VMEM DMA handled by the BlockSpec pipeline).
    o_ref[...] = x_ref[...]


def _sublane_multiple(dtype):
    """Sublane packing granularity: 8 for 32-bit, 16 for bf16, 32 for int8."""
    itemsize = jnp.dtype(dtype).itemsize
    return max(8, 32 // max(int(itemsize), 1))


def _lane_dense_cols(n):
    """Widest lane-dense column count (multiple of 128) that divides n."""
    for c in (4096, 2048, 1024, 512, 256, 128):
        if n % c == 0:
            return c
    return None


def _pick_tile_rows(rows, cols, itemsize, sublane):
    """Largest row-tile within the VMEM budget, sublane-aligned, preferring
    an exact divisor of `rows` (avoids a partial trailing block)."""
    budget = max(1, _MAX_TILE_BYTES // (cols * itemsize))
    if rows <= budget:
        # Single block covering the full row extent (always a legal block:
        # it equals the full array dim).
        return rows
    best = max((budget // sublane) * sublane, sublane)
    for t in range(best, sublane - 1, -sublane):
        if rows % t == 0:
            return t
    return best  # partial trailing block; Pallas masks the boundary writes


def _copy_2d(x2d, tile_rows, cols):
    rows = x2d.shape[0]
    grid = (pl.cdiv(rows, tile_rows),)
    return pl.pallas_call(
        _identity_kernel,
        out_shape=jax.ShapeDtypeStruct(x2d.shape, x2d.dtype),
        grid_spec=pltpu.PrefetchScalarGridSpec(
            num_scalar_prefetch=0,
            grid=grid,
            in_specs=[pl.BlockSpec((tile_rows, cols), lambda i: (i, 0))],
            out_specs=pl.BlockSpec((tile_rows, cols), lambda i: (i, 0)),
        ),
        compiler_params=pltpu.CompilerParams(
            dimension_semantics=("parallel",),
            vmem_limit_bytes=_VMEM_LIMIT_BYTES,
        ),
        # Identity copy: let the output share the input's HBM buffer so XLA
        # can elide the extra allocation (full win when the caller donates).
        input_output_aliases={0: 0},
    )(x2d)


def layer_base_forward(x, *, materialize=True):
    """Identity forward (LayerBase.forward) as a Pallas TPU kernel.

    materialize=False short-circuits at the JAX level (return x) since the
    op is a pure identity; materialize=True produces a fresh buffer via a
    tiled Pallas copy.
    """
    if not materialize:
        return x

    orig_shape = x.shape
    n = 1
    for d in orig_shape:
        n *= int(d)
    if n == 0:
        return x

    itemsize = int(jnp.dtype(x.dtype).itemsize)
    sublane = _sublane_multiple(x.dtype)

    cols = _lane_dense_cols(n)
    if cols is not None:
        # Pad-free path: view the tensor as a lane-dense (rows, cols) slab.
        rows = n // cols
        tile_rows = _pick_tile_rows(rows, cols, itemsize, sublane)
        out2d = _copy_2d(x.reshape(rows, cols), tile_rows, cols)
        return out2d.reshape(orig_shape)

    # Rare fallback: element count not a multiple of 128.
    # TODO(synk): handle the ragged tail in-kernel (pl.when + masked
    # pltpu.store) to avoid the pad/slice HBM round trips on this path.
    cols = _LANE
    rows = pl.cdiv(n, cols)
    rows_padded = pl.cdiv(rows, sublane) * sublane
    flat = jnp.pad(x.reshape(-1), (0, rows_padded * cols - n))
    tile_rows = _pick_tile_rows(rows_padded, cols, itemsize, sublane)
    out2d = _copy_2d(flat.reshape(rows_padded, cols), tile_rows, cols)
    return out2d.reshape(-1)[:n].reshape(orig_shape)


if __name__ == "__main__":
    key = jax.random.PRNGKey(0)
    # NCHW input, small shapes: batch=2, channels=4, spatial=16x16
    x = jax.random.normal(key, (2, 4, 16, 16), dtype=jnp.float32)

    y = layer_base_forward(x)
    jax.block_until_ready(y)

    assert y.shape == x.shape and y.dtype == x.dtype
    assert bool(jnp.allclose(y, x)), "identity forward mismatch"
    print("KERNEL_OK")
</pallas_src>

<mosaic_0001>
module attributes {stable_mosaic.version = 11 : i64} {
  func.func @_identity_kernel(%arg0: i32, %arg1: memref<1x2048xf32, #tpu.memory_space<vmem>>, %arg2: memref<1x2048xf32, #tpu.memory_space<vmem>>) attributes {dimension_semantics = [#tpu.dimension_semantics<parallel>], iteration_bounds = array<i64: 1>, scalar_prefetch = 0 : i64, scratch_operands = 0 : i64, tpu.core_type = #tpu.core_type<tc>, window_params = [{transform_indices = @transform_0, window_bounds = array<i64: 1, 2048>}, {transform_indices = @transform_1, window_bounds = array<i64: 1, 2048>}]} {
    %c0 = arith.constant 0 : index
    %c0_0 = arith.constant 0 : index
    %0 = vector.load %arg1[%c0, %c0_0] : memref<1x2048xf32, #tpu.memory_space<vmem>>, vector<1x2048xf32>
    %c0_1 = arith.constant 0 : index
    %c0_2 = arith.constant 0 : index
    %1 = vector.load %arg2[%c0_1, %c0_2] : memref<1x2048xf32, #tpu.memory_space<vmem>>, vector<1x2048xf32>
    tpu.vector_store %arg2[%c0_1, %c0_2], %0 {strides = array<i32>} : memref<1x2048xf32, #tpu.memory_space<vmem>>, vector<1x2048xf32>,
    return
  }
  func.func @transform_0(%arg0: i32) -> (i32, i32) {
    %c0_i32 = arith.constant 0 : i32
    %c0_i32_0 = arith.constant 0 : i32
    return %arg0, %c0_i32 : i32, i32
  }
  func.func @transform_1(%arg0: i32) -> (i32, i32) {
    %c0_i32 = arith.constant 0 : i32
    %c0_i32_0 = arith.constant 0 : i32
    return %arg0, %c0_i32 : i32, i32
  }
}

</mosaic_0001>

<bundles_post_ra>
// kernel: tpu_custom_call.1
= control target key start
LH: loop header
LB: loop body
LE: loop exit
PB: predicated region body
PF: predicated region fallthrough
CT: control target
= control target key end

     0   :  { %6 = vsyncpa [#allocation3], 0  ;;  %s104_s0 = inlined_call_operand.hbm [shape: f32[1,2048], index: 0, kind: input, shape index: {}, may-alias: {0,1}]   ;;  %s105_s1 = inlined_call_operand.hbm [shape: f32[1,2048], index: 1, kind: output, shape index: {}, may-alias: {0,1}]  }
   0x1   :  { %7 = vsyncpa [#allocation4], 0  ;;  %s86_s6 = smov [#allocation2]  }
   0x2   :  { %s14_s7 = sshll.u32 %s86_s6, 4  ;;  %s15_s7 = int_to_ptr.vmem [resolvable:$true] %s14_s7 }
   0x3   :  { %s50_s8 = scalar_lea.vmem %s15_s7, 256  ;;  %p55_p1 = scmp.lt.s32.totalorder %s15_s7, %s15_s7 }
   0x4   :  { %p51_p0 = scmp.ne.s32.totalorder %s15_s7, %s50_s8  ;;  %p56_p2 = scmp.lt.s32.totalorder %s50_s8, %s50_s8 }
   0x6   :  { %p57_p3 = por %p56_p2, %p55_p1 }
   0x8   :  { %p58_p4 = pnand %p57_p3, %p51_p0 }
   0xa   :  { %61 = shalt.err (!%p58_p4)
}
   0xb   :  { %17 = dma.hbm_to_vmem [thread:$0]  %s104_s0, 256, %s15_s7, [#allocation3]  }
   0xc   :  { %82 = dma.done.wait [#allocation3], 256  }
   0xd   :  { %83 = vsyncadd [#allocation3], 4294967040  ;;  %s87_s11 = smov [#allocation5]   ;;  %v21_v0 = vld [vmem:[#allocation2] sm:$0xff]  ;;  %v22_v1 = vld [vmem:[#allocation2 + $0x8] sm:$0xff] }
   0xe   :  { %s31_s12 = sshll.u32 %s87_s11, 4  ;;  %23 = vst [vmem:[#allocation5] sm:$0xff] %v21_v0  ;;  %24 = vst [vmem:[#allocation5 + $0x8] sm:$0xff] %v22_v1  ;;  %s32_s12 = int_to_ptr.vmem [resolvable:$true] %s31_s12 }
   0xf   :  { %s62_s13 = scalar_lea.vmem %s32_s12, 256  ;;  %p67_p6 = scmp.lt.s32.totalorder %s32_s12, %s32_s12 }
  0x10   :  { %p63_p5 = scmp.ne.s32.totalorder %s32_s12, %s62_s13  ;;  %p68_p7 = scmp.lt.s32.totalorder %s62_s13, %s62_s13 }
  0x12   :  { %p69_p8 = por %p68_p7, %p67_p6 }
  0x14   :  { %p70_p9 = pnand %p69_p8, %p63_p5 }
  0x16   :  { %73 = shalt.err (!%p70_p9)
}
  0x17   :  { %34 = dma.vmem_to_hbm [thread:$0]  %s32_s12, 256, %s105_s1, [#allocation4]  }
  0x18   :  { %84 = dma.done.wait [#allocation4], 256  }
  0x19   :  { %85 = vsyncadd [#allocation4], 4294967040 }
  0x1a   :  { %38 = vsyncpa [#allocation3], 1 }
  0x1b   :  { %39 = vsyncpa [#allocation4], 1 }

</bundles_post_ra>
